<compile_context>
chip_gen: v6e
topology: v6e:2x2x1
jax: 0.10.0
libtpu: 0.0.40
codegen_flags: <defaults>
</compile_context>

<pallas_src>
import numpy as np
import jax
import jax.numpy as jnp
from jax.experimental import pallas as pl
from jax.experimental.pallas import tpu as pltpu

# ---- model dimensions (small, consistent with the forward pass) -------------
N, C_IN, H, W = 2, 4, 16, 16
NUM_CLASSES = 5          # seg_pred channels (K)
NUM_LANES = 4            # exist_pred width  (L)
HW = H * W

ROWS_SEG = N * NUM_CLASSES          # 10 : seg rows of the fused output
ROWS_EX = N * NUM_LANES             # 8  : existence rows of the fused output
ROWS_ALL = ROWS_SEG + ROWS_EX       # 18
COLS_W = N * C_IN                   # 8  : block-diagonal contraction dim
COLS_SLAB = COLS_W + 1              # 9  : [ W_bd | bias_bd ]


def _model_kernel(x_ref, p_ref, seg_ref, ex_ref):
    # x_ref:   (N*C, HW)            lane-dense (HW = 256 on the lane axis)
    # p_ref:   (ROWS_ALL, COLS_SLAB) packed [W_bd | bias column]
    # seg_ref: (ROWS_SEG, HW)
    # ex_ref:  (ROWS_EX, 1)
    w_bd = p_ref[:, :COLS_W]                      # (18, 8)
    b_bd = p_ref[:, COLS_W:COLS_SLAB]             # (18, 1)

    # One fused MXU matmul: all batches, both heads.  Single bias broadcast.
    y = jnp.dot(w_bd, x_ref[...],
                preferred_element_type=jnp.float32) + b_bd     # (18, 256)

    # segmentation head: rows [0, N*K)  -> lane-dense unmasked stores
    seg_ref[...] = y[:ROWS_SEG, :].astype(seg_ref.dtype)

    # existence head: rows [N*K, N*(K+L)); weights pre-scaled by 1/HW
    # host-side, so a lane-sum (XLU slot) == global average pool.
    logits = jnp.sum(y[ROWS_SEG:, :], axis=-1, keepdims=True)   # (8, 1)
    ex_ref[...] = jax.nn.sigmoid(logits).astype(ex_ref.dtype)   # EUP exp/recip


def _make_params(w_seg, b_seg, w_ex, b_ex):
    """Pack all parameters into one block-diagonal slab (closure constants)."""
    w_ex_rows = w_ex.T / HW                        # (L, C), 1/HW folded in
    b_ex_rows = b_ex.T / HW                        # (L, 1), sum over HW restores b_ex
    w_bd = jnp.zeros((ROWS_ALL, COLS_W), jnp.float32)
    b_bd = jnp.zeros((ROWS_ALL, 1), jnp.float32)
    for n in range(N):
        w_bd = w_bd.at[n * NUM_CLASSES:(n + 1) * NUM_CLASSES,
                       n * C_IN:(n + 1) * C_IN].set(w_seg)
        b_bd = b_bd.at[n * NUM_CLASSES:(n + 1) * NUM_CLASSES, :].set(b_seg)
        w_bd = w_bd.at[ROWS_SEG + n * NUM_LANES:ROWS_SEG + (n + 1) * NUM_LANES,
                       n * C_IN:(n + 1) * C_IN].set(w_ex_rows)
        b_bd = b_bd.at[ROWS_SEG + n * NUM_LANES:ROWS_SEG + (n + 1) * NUM_LANES,
                       :].set(b_ex_rows)
    return jnp.concatenate([w_bd, b_bd], axis=1)   # (18, 9)


def _run_model(x_nchw, params):
    """Synthetic wrapped model: returns (seg_pred [N,K,H,W], exist_pred [N,L])."""
    n, c, h, w = x_nchw.shape
    hw = h * w
    # NCHW -> (N*C, HW): pure row-major reshape, no transpose / data movement.
    x_flat = x_nchw.reshape(n * c, hw)

    seg_flat, ex_flat = pl.pallas_call(
        _model_kernel,
        out_shape=(
            jax.ShapeDtypeStruct((ROWS_SEG, hw), jnp.float32),
            jax.ShapeDtypeStruct((ROWS_EX, 1), jnp.float32),
        ),
        # No grid: whole problem lives in VMEM, no pipeline scaffolding.
        in_specs=[
            pl.BlockSpec(memory_space=pltpu.MemorySpace.VMEM),
            pl.BlockSpec(memory_space=pltpu.MemorySpace.VMEM),
        ],
        out_specs=(
            pl.BlockSpec(memory_space=pltpu.MemorySpace.VMEM),
            pl.BlockSpec(memory_space=pltpu.MemorySpace.VMEM),
        ),
    )(x_flat, params)

    # (N*K, HW) -> (N, K, H, W) and (N*L, 1) -> (N, L): free row-major reshapes.
    seg_pred = seg_flat.reshape(n, NUM_CLASSES, h, w)
    exist_pred = ex_flat.reshape(n, NUM_LANES)
    return seg_pred, exist_pred


class SegmentationModelOutputWrapper:
    """JAX/Pallas port of the PyTorch wrapper: returns seg_pred, stashes exist_pred."""

    def __init__(self, model_fn):
        self.model = model_fn
        self._exist_pred_dev = None

    def __call__(self, x):
        seg_pred, exist_pred = self.model(x)[:2]
        # analog of exist_pred.detach().cpu().numpy(), but non-blocking:
        # kick off the device->host copy now, materialize numpy only on access.
        try:
            exist_pred.copy_to_host_async()
        except AttributeError:
            pass
        self._exist_pred_dev = exist_pred
        return seg_pred

    @property
    def exist_pred(self):
        if self._exist_pred_dev is None:
            return None
        return np.asarray(jax.device_get(self._exist_pred_dev))


if __name__ == "__main__":
    key = jax.random.PRNGKey(0)
    kx, kws, kbs, kwe, kbe = jax.random.split(key, 5)

    # deterministic inputs & parameters
    x = jax.random.normal(kx, (N, C_IN, H, W), dtype=jnp.float32)
    w_seg = jax.random.normal(kws, (NUM_CLASSES, C_IN), dtype=jnp.float32) * 0.1
    b_seg = jax.random.normal(kbs, (NUM_CLASSES, 1), dtype=jnp.float32) * 0.1
    w_ex = jax.random.normal(kwe, (C_IN, NUM_LANES), dtype=jnp.float32) * 0.1
    b_ex = jax.random.normal(kbe, (1, NUM_LANES), dtype=jnp.float32) * 0.1

    # packed block-diagonal parameters (built once; constant under jit)
    params = _make_params(w_seg, b_seg, w_ex, b_ex)

    model_fn = jax.jit(lambda inp: _run_model(inp, params))
    wrapper = SegmentationModelOutputWrapper(model_fn)

    seg = wrapper(x)
    seg = jax.block_until_ready(seg)
    exist_np = wrapper.exist_pred

    # light sanity check against a pure-JAX reference of the same synthetic model
    x_lane = x.reshape(N, C_IN, HW)
    seg_ref = (jnp.einsum('kc,nch->nkh', w_seg, x_lane)
               + b_seg[None, :, :]).reshape(N, NUM_CLASSES, H, W)
    ex_ref = jax.nn.sigmoid(jnp.mean(x_lane, axis=-1) @ w_ex + b_ex)
    assert seg.shape == (N, NUM_CLASSES, H, W)
    assert exist_np.shape == (N, NUM_LANES)
    np.testing.assert_allclose(np.asarray(seg), np.asarray(seg_ref),
                               rtol=1e-4, atol=1e-5)
    np.testing.assert_allclose(exist_np, np.asarray(ex_ref),
                               rtol=1e-4, atol=1e-5)

    print("KERNEL_OK")
</pallas_src>

<mosaic_0001>
module attributes {stable_mosaic.version = 11 : i64} {
  func.func @_model_kernel(%arg0: memref<8x256xf32, #tpu.memory_space<vmem>>, %arg1: memref<18x9xf32, #tpu.memory_space<vmem>>, %arg2: memref<10x256xf32, #tpu.memory_space<vmem>>, %arg3: memref<8x1xf32, #tpu.memory_space<vmem>>) attributes {dimension_semantics = [], scalar_prefetch = 0 : i64, scratch_operands = 0 : i64, tpu.core_type = #tpu.core_type<tc>} {
    %c0 = arith.constant 0 : index
    %c0_0 = arith.constant 0 : index
    %0 = vector.load %arg1[%c0, %c0_0] : memref<18x9xf32, #tpu.memory_space<vmem>>, vector<18x8xf32>
    %c0_1 = arith.constant 0 : index
    %c8 = arith.constant 8 : index
    %1 = vector.load %arg1[%c0_1, %c8] : memref<18x9xf32, #tpu.memory_space<vmem>>, vector<18x1xf32>
    %c0_2 = arith.constant 0 : index
    %c0_3 = arith.constant 0 : index
    %2 = vector.load %arg0[%c0_2, %c0_3] : memref<8x256xf32, #tpu.memory_space<vmem>>, vector<8x256xf32>
    %cst = arith.constant dense<0.000000e+00> : vector<18x256xf32>
    %3 = tpu.matmul %0, %2, %cst {dimension_numbers = #tpu.dot_dimension_numbers<[1], [0], [0], [1], [0, 0, 1, 1], [], []>} : vector<18x8xf32>, vector<8x256xf32>, vector<18x256xf32> -> vector<18x256xf32>
    %4 = vector.broadcast %1 : vector<18x1xf32> to vector<18x256xf32>
    %5 = arith.addf %3, %4 : vector<18x256xf32>
    %6 = vector.extract_strided_slice %5 {offsets = [0, 0], sizes = [10, 256], strides = [1, 1]} : vector<18x256xf32> to vector<10x256xf32>
    %c0_4 = arith.constant 0 : index
    %c0_5 = arith.constant 0 : index
    %7 = vector.load %arg2[%c0_4, %c0_5] : memref<10x256xf32, #tpu.memory_space<vmem>>, vector<10x256xf32>
    tpu.vector_store %arg2[%c0_4, %c0_5], %6 {strides = array<i32>} : memref<10x256xf32, #tpu.memory_space<vmem>>, vector<10x256xf32>,
    %8 = vector.extract_strided_slice %5 {offsets = [10, 0], sizes = [8, 256], strides = [1, 1]} : vector<18x256xf32> to vector<8x256xf32>
    %cst_6 = arith.constant dense<0.000000e+00> : vector<8xf32>
    %9 = vector.multi_reduction <add>, %8, %cst_6 [1] : vector<8x256xf32> to vector<8xf32>
    %10 = vector.shape_cast %9 : vector<8xf32> to vector<8x1xf32>
    %11 = arith.negf %10 : vector<8x1xf32>
    %12 = math.exp %11 : vector<8x1xf32>
    %cst_7 = arith.constant 1.000000e+00 : f32
    %13 = vector.broadcast %cst_7 : f32 to vector<8x1xf32>
    %14 = arith.addf %13, %12 : vector<8x1xf32>
    %15 = arith.divf %13, %14 : vector<8x1xf32>
    %c0_8 = arith.constant 0 : index
    %c0_9 = arith.constant 0 : index
    %16 = vector.load %arg3[%c0_8, %c0_9] : memref<8x1xf32, #tpu.memory_space<vmem>>, vector<8x1xf32>
    tpu.vector_store %arg3[%c0_8, %c0_9], %15 {strides = array<i32>} : memref<8x1xf32, #tpu.memory_space<vmem>>, vector<8x1xf32>,
    return
  }
}

</mosaic_0001>

<bundles_post_ra>
// kernel: _lambda_.1
= control target key start
LH: loop header
LB: loop body
LE: loop exit
PB: predicated region body
PF: predicated region fallthrough
CT: control target
= control target key end

     0   :  { %v181_v2 = vmov 0.0   ;;  %vm33_vm0 = vcmask 64512   ;;  %v182_v6 = vmov 8   ;;  %vm127_vm1 = vcmask 1047554   ;;  %s236_s0 = inlined_call_operand.vmem [shape: f32[8,256], index: 0, kind: input, shape index: {}]   ;;  %s237_s1 = inlined_call_operand.vmem [shape: f32[18,9], index: 1, kind: input, shape index: {}]   ;;  %s238_s2 = inlined_call_operand.vmem [shape: f32[10,256], index: 2, kind: output, shape index: {0}]   ;;  %s239_s3 = inlined_call_operand.vmem [shape: f32[8,1], index: 3, kind: output, shape index: {1}]  }
   0x1   :  { %v17_v0 = vld [vmem:[%s236_s0 + $0x8] sm:$0xff]  ;;  %v16_v1 = vld [vmem:[%s236_s0] sm:$0xff]  ;;  %104 = vmatprep.mubr.f32.mxu0 %v181_v2  ;;  %110 = vmatprep.mubr.f32.mxu1 %v181_v2  ;;  %v15_v5 = vld [vmem:[%s237_s1 + $0x10] sm:$0x3]  ;;  %vm133_vm2 = vcmask 1041408   ;;  %vm151_vm3 = vcmask 7170  }
   0x2   :  { %v13_v3 = vld [vmem:[%s237_s1] sm:$0xff]  ;;  %70 = vmatprep.subr.mxu0 %v17_v0  ;;  %168 = vmatprep.subr.mxu1 %v17_v0  ;;  %v14_v4 = vld [vmem:[%s237_s1 + $0x8] sm:$0xff]  ;;  %vm153_vm4 = vcmask 1024  }
   0x3   :  { %71 = vmatpush1.msra.mxu0 %v16_v1  ;;  %169 = vmatpush1.msra.mxu1 %v16_v1 }
   0x4   :  { %163 = vmatmul.mubr.msk.f32.vlgmr.msra.gmra.mxu0 %vm33_vm0, %v13_v3  ;;  %164 = vmatmul.mubr.msk.f32.vlgmr.msra.gmra.mxu1 %vm33_vm0, %v14_v4 }
   0x5   :  { %116 = vmatprep.mubr.f32.mxu1 %v181_v2  ;;  %172 = vset.pattern.permute.xlu0 %v182_v6 }
   0x6   :  { %25 = vperm.xlu0 %172, %v14_v4  }
   0x8   :  { %165 = vmatmul.mubr.msk.f32.gmra.mxu1 %vm33_vm0, %v15_v5 }
   0xa   :  { %30 = vperm.xlu0 %172, %v15_v5  }
   0xe   :  { %20 = vperm.xlu0 %172, %v13_v3  }
  0x81   :  { %v26_v7 = vpop.permute.xlu0 %25 }
  0x85   :  { %v31_v8 = vpop.permute.xlu0 %30 }
  0x89   :  { %v21_v9 = vpop.permute.xlu0 %20 }
  0xc4   :  { %v106_v10 = vpop.f32.mrf.mxu0  ;;  %v112_v11 = vpop.f32.mrf.mxu1 }
  0xc5   :  { %v113_v12 = vadd.f32 %v112_v11, %v26_v7  ;;  %v107_v13 = vadd.f32 %v106_v10, %v21_v9 }
  0xc6   :  { %v108_v14 = vpop.f32.mrf.mxu0  ;;  %v114_v15 = vpop.f32.mrf.mxu1 }
  0xc7   :  { %125 = vst [vmem:[%s238_s2 + $0x10] sm:$0x3] %v113_v12  ;;  %123 = vst [vmem:[%s238_s2] sm:$0xff] %v107_v13  ;;  %v109_v16 = vadd.f32 %v108_v14, %v21_v9  ;;  %v115_v17 = vadd.f32 %v114_v15, %v26_v7  ;;  %v128_v20 = vsel %vm127_vm1, %v113_v12, 0.0 }
  0xc8   :  { %v118_v18 = vpop.f32.mrf.mxu1 }
  0xc9   :  { %124 = vst [vmem:[%s238_s2 + $0x8] sm:$0xff] %v109_v16  ;;  %126 = vst [vmem:[%s238_s2 + $0x18] sm:$0x3] %v115_v17  ;;  %v119_v19 = vadd.f32 %v118_v18, %v31_v8  ;;  %v129_v21 = vsel %vm127_vm1, %v115_v17, 0.0 }
  0xca   :  { %v120_v22 = vpop.f32.mrf.mxu1  ;;  %v130_v23 = vadd.f32 %v129_v21, %v128_v20 }
  0xcb   :  { %v121_v24 = vadd.f32 %v120_v22, %v31_v8  ;;  %v134_v25 = vsel %vm133_vm2, %v119_v19, 0.0 }
  0xcc   :  { %131 = vadd.xlane.f32.xlu1 %v130_v23 }
  0xcd   :  { %v135_v26 = vsel %vm133_vm2, %v121_v24, 0.0 }
  0xce   :  { %v136_v27 = vadd.f32 %v135_v26, %v134_v25 }
  0xd0   :  { %137 = vadd.xlane.f32.xlu1 %v136_v27 }
 0x155   :  { %v132_v28 = vpop.xlane.xlu1 %131 }
 0x156   :  { %v166_v29 = vmul.f32 -1.442695, %v132_v28 }
 0x158   :  { %173 = vpow2.f32 %v166_v29 }
 0x159   :  { %v138_v30 = vpop.xlane.xlu1 %137 }
 0x15a   :  { %v167_v31 = vmul.f32 -1.442695, %v138_v30 }
 0x15c   :  { %175 = vpow2.f32 %v167_v31 }
 0x165   :  { %v174_v32 = vpop.eup %173 }
 0x166   :  { %v145_v33 = vadd.f32 1.0, %v174_v32 }
 0x168   :  { %177 = vrcp.f32 %v145_v33 }
 0x169   :  { %v176_v34 = vpop.eup %175 }
 0x16a   :  { %v146_v35 = vadd.f32 1.0, %v176_v34 }
 0x16c   :  { %179 = vrcp.f32 %v146_v35 }
 0x175   :  { %v178_v36 = vpop.eup %177 }
 0x176   :  { %152 = vst.msk [vmem:[%s239_s3 - $0x2] sm:$0xfc] %vm151_vm3, %v178_v36 }
 0x179   :  { %v180_v37 = vpop.eup %179 }
 0x17a   :  { %154 = vst.msk [vmem:[%s239_s3 + $0x6] sm:$0x3] %vm153_vm4, %v180_v37 }

</bundles_post_ra>
